<compile_context>
chip_gen: v6e
topology: v6e:2x2x1
jax: 0.10.0
libtpu: 0.0.40
codegen_flags: <defaults>
</compile_context>

<pallas_src>
import jax
import jax.numpy as jnp
import numpy as np
from jax.experimental import pallas as pl
from jax.experimental.pallas import tpu as pltpu

_EPS = 1e-5


# ------------------------------ Pallas kernel -------------------------------
def _fused_resnet_block_kernel(x_ref, m1_ref, g1_ref, b1_ref,
                               m2_ref, g2_ref, b2_ref,
                               gsum_ref, gexp_ref, out_ref):
    """x_ref: (N, H, W*C) folded activations.  m*: (3*W*C, W*C) folded conv
    weights (reflect pad along W baked in).  g*/b*: (1, C) BN affine params.
    gsum: (W*C, C) folds lane positions to channels; gexp: (C, W*C) expands."""
    x = x_ref[...]                              # (N, H, WC) f32
    gsum = gsum_ref[...]                        # (WC, C)
    gexp = gexp_ref[...]                        # (C, WC)

    n, h, wc = x.shape
    c = g1_ref.shape[1]
    count = float(n * h * (wc // c))            # N*H*W elements per channel

    def conv3x3_reflect(inp, m):
        # Reflect pad along H -> three row-shifted slabs (rows h-1, h, h+1).
        up = jnp.concatenate([inp[:, 1:2], inp[:, :-1]], axis=1)   # row reflect(h-1)
        dn = jnp.concatenate([inp[:, 1:], inp[:, -2:-1]], axis=1)  # row reflect(h+1)
        taps = jnp.concatenate([up, inp, dn], axis=-1)             # (N, H, 3*WC)
        # Single large-K contraction; reflect pad along W + channel mixing are
        # encoded in the banded matrix m.
        return jax.lax.dot_general(
            taps, m, (((2,), (0,)), ((), ())),
            preferred_element_type=jnp.float32)                    # (N, H, WC)

    def batchnorm(y, gamma, beta):
        # One-pass sum / sum-of-squares, reduced per folded-lane position ...
        s = jnp.sum(jnp.sum(y, axis=0), axis=0, keepdims=True)         # (1, WC)
        ss = jnp.sum(jnp.sum(y * y, axis=0), axis=0, keepdims=True)    # (1, WC)
        # ... then folded down to per-channel stats with a tiny matmul.
        s_c = jax.lax.dot_general(s, gsum, (((1,), (0,)), ((), ())),
                                  preferred_element_type=jnp.float32)  # (1, C)
        ss_c = jax.lax.dot_general(ss, gsum, (((1,), (0,)), ((), ())),
                                   preferred_element_type=jnp.float32)  # (1, C)
        mean = s_c / count
        var = ss_c / count - mean * mean                                # biased var
        scale_c = gamma * jax.lax.rsqrt(var + _EPS)                     # (1, C)
        shift_c = beta - mean * scale_c                                 # (1, C)
        # Expand per-channel scale/shift back to the folded (W*C) lane axis.
        scale = jax.lax.dot_general(scale_c, gexp, (((1,), (0,)), ((), ())),
                                    preferred_element_type=jnp.float32)  # (1, WC)
        shift = jax.lax.dot_general(shift_c, gexp, (((1,), (0,)), ((), ())),
                                    preferred_element_type=jnp.float32)  # (1, WC)
        return y * scale + shift

    y1 = conv3x3_reflect(x, m1_ref[...])
    y1 = jnp.maximum(batchnorm(y1, g1_ref[...], b1_ref[...]), 0.0)   # BN + ReLU

    y2 = conv3x3_reflect(y1, m2_ref[...])
    y2 = batchnorm(y2, g2_ref[...], b2_ref[...])

    out_ref[...] = x + y2                                            # residual add


def _vmem_spec():
    return pl.BlockSpec(memory_space=pltpu.MemorySpace.VMEM)


# ------------------------------ Public wrapper -------------------------------
def resnet_block_forward(x_nchw, params):
    """x_nchw: (N, C, H, W) float32; returns (N, C, H, W) float32."""
    m1, g1, b1, m2, g2, b2, gsum, gexp = params
    N, C, H, W = x_nchw.shape
    # NCHW -> NHWC -> folded lane-dense (N, H, W*C)
    x = jnp.transpose(x_nchw, (0, 2, 3, 1)).reshape(N, H, W * C)
    x = x.astype(jnp.float32)

    out = pl.pallas_call(
        _fused_resnet_block_kernel,
        out_shape=jax.ShapeDtypeStruct((N, H, W * C), jnp.float32),
        in_specs=[_vmem_spec()] * 9,
        out_specs=_vmem_spec(),
        compiler_params=pltpu.CompilerParams(
            vmem_limit_bytes=32 * 1024 * 1024),
    )(x, m1, g1, b1, m2, g2, b2, gsum, gexp)

    return jnp.transpose(out.reshape(N, H, W, C), (0, 3, 1, 2))


# ----------------------- Host-side parameter preparation ---------------------
def _reflect_shift_matrix(width, dx):
    """S[w_in, w_out] = 1 iff reflect(w_out + dx - 1) == w_in (ReflectionPad(1))."""
    S = np.zeros((width, width), np.float32)
    for w_out in range(width):
        w_in = w_out + dx - 1
        if w_in < 0:
            w_in = 1
        elif w_in >= width:
            w_in = width - 2
        S[w_in, w_out] = 1.0
    return S


def _folded_conv_matrix(w_oihw, width):
    """(Cout, Cin, 3, 3) -> (3*W*C, W*C) banded matrix; rows are grouped by the
    H-tap (dy in {above, same, below}), reflect pad along W is baked in."""
    C = w_oihw.shape[0]
    w = jnp.transpose(w_oihw, (2, 3, 1, 0)).astype(jnp.float32)  # (ky, kx, Cin, Cout)
    blocks = []
    for dy in range(3):
        m = jnp.zeros((width * C, width * C), jnp.float32)
        for dx in range(3):
            S = jnp.asarray(_reflect_shift_matrix(width, dx))
            m = m + jnp.kron(S, w[dy, dx])
        blocks.append(m)
    return jnp.concatenate(blocks, axis=0)


def prepare_params(w1_oihw, g1, b1, w2_oihw, g2, b2, width):
    C = w1_oihw.shape[0]
    gsum = jnp.asarray(np.kron(np.ones((width, 1), np.float32),
                               np.eye(C, dtype=np.float32)))   # (W*C, C)
    gexp = jnp.asarray(np.kron(np.ones((1, width), np.float32),
                               np.eye(C, dtype=np.float32)))   # (C, W*C)
    return (
        _folded_conv_matrix(w1_oihw, width),
        g1.reshape(1, C).astype(jnp.float32),
        b1.reshape(1, C).astype(jnp.float32),
        _folded_conv_matrix(w2_oihw, width),
        g2.reshape(1, C).astype(jnp.float32),
        b2.reshape(1, C).astype(jnp.float32),
        gsum, gexp,
    )


# ---------------------------- Pure-JAX reference -----------------------------
def _ref_conv_bn(x_nchw, w_oihw, gamma, beta):
    xp = jnp.pad(x_nchw, ((0, 0), (0, 0), (1, 1), (1, 1)), mode="reflect")
    y = jax.lax.conv_general_dilated(
        xp, w_oihw, (1, 1), "VALID",
        dimension_numbers=("NCHW", "OIHW", "NCHW"))
    mean = jnp.mean(y, axis=(0, 2, 3), keepdims=True)
    var = jnp.mean((y - mean) ** 2, axis=(0, 2, 3), keepdims=True)
    y = (y - mean) * jax.lax.rsqrt(var + _EPS)
    return y * gamma.reshape(1, -1, 1, 1) + beta.reshape(1, -1, 1, 1)


def ref_forward(x_nchw, w1_oihw, g1, b1, w2_oihw, g2, b2):
    h = jnp.maximum(_ref_conv_bn(x_nchw, w1_oihw, g1, b1), 0.0)
    return x_nchw + _ref_conv_bn(h, w2_oihw, g2, b2)


# ----------------------------------- Main ------------------------------------
if __name__ == "__main__":
    # C=8, W=16 -> folded lane width W*C = 128 (exactly one vreg of lanes).
    N, C, H, W = 2, 8, 16, 16
    key = jax.random.PRNGKey(0)
    kx, kw1, kw2, kg1, kb1, kg2, kb2 = jax.random.split(key, 7)

    x = jax.random.normal(kx, (N, C, H, W), jnp.float32)

    # Conv weights in PyTorch OIHW convention, no bias (use_bias=False).
    w1_oihw = 0.1 * jax.random.normal(kw1, (C, C, 3, 3), jnp.float32)
    w2_oihw = 0.1 * jax.random.normal(kw2, (C, C, 3, 3), jnp.float32)
    # BatchNorm affine params (deterministic, non-trivial).
    g1 = 1.0 + 0.1 * jax.random.normal(kg1, (C,), jnp.float32)
    b1 = 0.1 * jax.random.normal(kb1, (C,), jnp.float32)
    g2 = 1.0 + 0.1 * jax.random.normal(kg2, (C,), jnp.float32)
    b2 = 0.1 * jax.random.normal(kb2, (C,), jnp.float32)

    params = prepare_params(w1_oihw, g1, b1, w2_oihw, g2, b2, W)

    out = jax.block_until_ready(resnet_block_forward(x, params))

    ref = jax.block_until_ready(ref_forward(x, w1_oihw, g1, b1, w2_oihw, g2, b2))
    np.testing.assert_allclose(np.asarray(out), np.asarray(ref),
                               rtol=1e-3, atol=1e-3)

    print("KERNEL_OK")
</pallas_src>

<mosaic_0001>
module attributes {stable_mosaic.version = 11 : i64} {
  func.func @_fused_resnet_block_kernel(%arg0: memref<2x16x128xf32, #tpu.memory_space<vmem>>, %arg1: memref<384x128xf32, #tpu.memory_space<vmem>>, %arg2: memref<1x8xf32, #tpu.memory_space<vmem>>, %arg3: memref<1x8xf32, #tpu.memory_space<vmem>>, %arg4: memref<384x128xf32, #tpu.memory_space<vmem>>, %arg5: memref<1x8xf32, #tpu.memory_space<vmem>>, %arg6: memref<1x8xf32, #tpu.memory_space<vmem>>, %arg7: memref<128x8xf32, #tpu.memory_space<vmem>>, %arg8: memref<8x128xf32, #tpu.memory_space<vmem>>, %arg9: memref<2x16x128xf32, #tpu.memory_space<vmem>>) attributes {dimension_semantics = [], scalar_prefetch = 0 : i64, scratch_operands = 0 : i64, tpu.core_type = #tpu.core_type<tc>} {
    %c0 = arith.constant 0 : index
    %c0_0 = arith.constant 0 : index
    %c0_1 = arith.constant 0 : index
    %0 = vector.load %arg0[%c0, %c0_0, %c0_1] : memref<2x16x128xf32, #tpu.memory_space<vmem>>, vector<2x16x128xf32>
    %c0_2 = arith.constant 0 : index
    %c0_3 = arith.constant 0 : index
    %1 = vector.load %arg7[%c0_2, %c0_3] : memref<128x8xf32, #tpu.memory_space<vmem>>, vector<128x8xf32>
    %c0_4 = arith.constant 0 : index
    %c0_5 = arith.constant 0 : index
    %2 = vector.load %arg8[%c0_4, %c0_5] : memref<8x128xf32, #tpu.memory_space<vmem>>, vector<8x128xf32>
    %c0_6 = arith.constant 0 : index
    %c0_7 = arith.constant 0 : index
    %3 = vector.load %arg1[%c0_6, %c0_7] : memref<384x128xf32, #tpu.memory_space<vmem>>, vector<384x128xf32>
    %4 = vector.extract_strided_slice %0 {offsets = [0, 1, 0], sizes = [2, 1, 128], strides = [1, 1, 1]} : vector<2x16x128xf32> to vector<2x1x128xf32>
    %5 = vector.extract_strided_slice %0 {offsets = [0, 0, 0], sizes = [2, 15, 128], strides = [1, 1, 1]} : vector<2x16x128xf32> to vector<2x15x128xf32>
    %6 = tpu.concatenate %4, %5 in 1 : vector<2x1x128xf32>, vector<2x15x128xf32> -> vector<2x16x128xf32>
    %7 = vector.extract_strided_slice %0 {offsets = [0, 1, 0], sizes = [2, 15, 128], strides = [1, 1, 1]} : vector<2x16x128xf32> to vector<2x15x128xf32>
    %8 = vector.extract_strided_slice %0 {offsets = [0, 14, 0], sizes = [2, 1, 128], strides = [1, 1, 1]} : vector<2x16x128xf32> to vector<2x1x128xf32>
    %9 = tpu.concatenate %7, %8 in 1 : vector<2x15x128xf32>, vector<2x1x128xf32> -> vector<2x16x128xf32>
    %10 = tpu.concatenate %6, %0, %9 in 2 : vector<2x16x128xf32>, vector<2x16x128xf32>, vector<2x16x128xf32> -> vector<2x16x384xf32>
    %cst = arith.constant dense<0.000000e+00> : vector<2x16x128xf32>
    %11 = tpu.matmul %10, %3, %cst {dimension_numbers = #tpu.dot_dimension_numbers<[2], [0], [0, 1], [1], [0, 0, 0, 1, 1, 1], [], []>} : vector<2x16x384xf32>, vector<384x128xf32>, vector<2x16x128xf32> -> vector<2x16x128xf32>
    %c0_8 = arith.constant 0 : index
    %c0_9 = arith.constant 0 : index
    %12 = vector.load %arg2[%c0_8, %c0_9] : memref<1x8xf32, #tpu.memory_space<vmem>>, vector<1x8xf32>
    %c0_10 = arith.constant 0 : index
    %c0_11 = arith.constant 0 : index
    %13 = vector.load %arg3[%c0_10, %c0_11] : memref<1x8xf32, #tpu.memory_space<vmem>>, vector<1x8xf32>
    %cst_12 = arith.constant dense<0.000000e+00> : vector<16x128xf32>
    %14 = vector.multi_reduction <add>, %11, %cst_12 [0] : vector<2x16x128xf32> to vector<16x128xf32>
    %cst_13 = arith.constant dense<0.000000e+00> : vector<128xf32>
    %15 = vector.multi_reduction <add>, %14, %cst_13 [0] : vector<16x128xf32> to vector<128xf32>
    %16 = vector.shape_cast %15 : vector<128xf32> to vector<1x128xf32>
    %17 = arith.mulf %11, %11 : vector<2x16x128xf32>
    %cst_14 = arith.constant dense<0.000000e+00> : vector<16x128xf32>
    %18 = vector.multi_reduction <add>, %17, %cst_14 [0] : vector<2x16x128xf32> to vector<16x128xf32>
    %cst_15 = arith.constant dense<0.000000e+00> : vector<128xf32>
    %19 = vector.multi_reduction <add>, %18, %cst_15 [0] : vector<16x128xf32> to vector<128xf32>
    %20 = vector.shape_cast %19 : vector<128xf32> to vector<1x128xf32>
    %cst_16 = arith.constant dense<0.000000e+00> : vector<1x8xf32>
    %21 = tpu.matmul %16, %1, %cst_16 {dimension_numbers = #tpu.dot_dimension_numbers<[1], [0], [0], [1], [0, 0, 1, 1], [], []>} : vector<1x128xf32>, vector<128x8xf32>, vector<1x8xf32> -> vector<1x8xf32>
    %cst_17 = arith.constant dense<0.000000e+00> : vector<1x8xf32>
    %22 = tpu.matmul %20, %1, %cst_17 {dimension_numbers = #tpu.dot_dimension_numbers<[1], [0], [0], [1], [0, 0, 1, 1], [], []>} : vector<1x128xf32>, vector<128x8xf32>, vector<1x8xf32> -> vector<1x8xf32>
    %cst_18 = arith.constant 5.120000e+02 : f32
    %23 = vector.broadcast %cst_18 : f32 to vector<1x8xf32>
    %24 = arith.divf %21, %23 : vector<1x8xf32>
    %cst_19 = arith.constant 5.120000e+02 : f32
    %25 = vector.broadcast %cst_19 : f32 to vector<1x8xf32>
    %26 = arith.divf %22, %25 : vector<1x8xf32>
    %27 = arith.mulf %24, %24 : vector<1x8xf32>
    %28 = arith.subf %26, %27 : vector<1x8xf32>
    %cst_20 = arith.constant 9.99999974E-6 : f32
    %29 = vector.broadcast %cst_20 : f32 to vector<1x8xf32>
    %30 = arith.addf %28, %29 : vector<1x8xf32>
    %31 = math.rsqrt %30 : vector<1x8xf32>
    %32 = arith.mulf %12, %31 : vector<1x8xf32>
    %33 = arith.mulf %24, %32 : vector<1x8xf32>
    %34 = arith.subf %13, %33 : vector<1x8xf32>
    %cst_21 = arith.constant dense<0.000000e+00> : vector<1x128xf32>
    %35 = tpu.matmul %32, %2, %cst_21 {dimension_numbers = #tpu.dot_dimension_numbers<[1], [0], [0], [1], [0, 0, 1, 1], [], []>} : vector<1x8xf32>, vector<8x128xf32>, vector<1x128xf32> -> vector<1x128xf32>
    %cst_22 = arith.constant dense<0.000000e+00> : vector<1x128xf32>
    %36 = tpu.matmul %34, %2, %cst_22 {dimension_numbers = #tpu.dot_dimension_numbers<[1], [0], [0], [1], [0, 0, 1, 1], [], []>} : vector<1x8xf32>, vector<8x128xf32>, vector<1x128xf32> -> vector<1x128xf32>
    %37 = vector.shape_cast %35 : vector<1x128xf32> to vector<1x1x128xf32>
    %38 = vector.broadcast %37 : vector<1x1x128xf32> to vector<2x16x128xf32>
    %39 = arith.mulf %11, %38 : vector<2x16x128xf32>
    %40 = vector.shape_cast %36 : vector<1x128xf32> to vector<1x1x128xf32>
    %41 = vector.broadcast %40 : vector<1x1x128xf32> to vector<2x16x128xf32>
    %42 = arith.addf %39, %41 : vector<2x16x128xf32>
    %cst_23 = arith.constant 0.000000e+00 : f32
    %43 = vector.broadcast %cst_23 : f32 to vector<2x16x128xf32>
    %44 = arith.maximumf %42, %43 : vector<2x16x128xf32>
    %c0_24 = arith.constant 0 : index
    %c0_25 = arith.constant 0 : index
    %45 = vector.load %arg4[%c0_24, %c0_25] : memref<384x128xf32, #tpu.memory_space<vmem>>, vector<384x128xf32>
    %46 = vector.extract_strided_slice %44 {offsets = [0, 1, 0], sizes = [2, 1, 128], strides = [1, 1, 1]} : vector<2x16x128xf32> to vector<2x1x128xf32>
    %47 = vector.extract_strided_slice %44 {offsets = [0, 0, 0], sizes = [2, 15, 128], strides = [1, 1, 1]} : vector<2x16x128xf32> to vector<2x15x128xf32>
    %48 = tpu.concatenate %46, %47 in 1 : vector<2x1x128xf32>, vector<2x15x128xf32> -> vector<2x16x128xf32>
    %49 = vector.extract_strided_slice %44 {offsets = [0, 1, 0], sizes = [2, 15, 128], strides = [1, 1, 1]} : vector<2x16x128xf32> to vector<2x15x128xf32>
    %50 = vector.extract_strided_slice %44 {offsets = [0, 14, 0], sizes = [2, 1, 128], strides = [1, 1, 1]} : vector<2x16x128xf32> to vector<2x1x128xf32>
    %51 = tpu.concatenate %49, %50 in 1 : vector<2x15x128xf32>, vector<2x1x128xf32> -> vector<2x16x128xf32>
    %52 = tpu.concatenate %48, %44, %51 in 2 : vector<2x16x128xf32>, vector<2x16x128xf32>, vector<2x16x128xf32> -> vector<2x16x384xf32>
    %cst_26 = arith.constant dense<0.000000e+00> : vector<2x16x128xf32>
    %53 = tpu.matmul %52, %45, %cst_26 {dimension_numbers = #tpu.dot_dimension_numbers<[2], [0], [0, 1], [1], [0, 0, 0, 1, 1, 1], [], []>} : vector<2x16x384xf32>, vector<384x128xf32>, vector<2x16x128xf32> -> vector<2x16x128xf32>
    %c0_27 = arith.constant 0 : index
    %c0_28 = arith.constant 0 : index
    %54 = vector.load %arg5[%c0_27, %c0_28] : memref<1x8xf32, #tpu.memory_space<vmem>>, vector<1x8xf32>
    %c0_29 = arith.constant 0 : index
    %c0_30 = arith.constant 0 : index
    %55 = vector.load %arg6[%c0_29, %c0_30] : memref<1x8xf32, #tpu.memory_space<vmem>>, vector<1x8xf32>
    %cst_31 = arith.constant dense<0.000000e+00> : vector<16x128xf32>
    %56 = vector.multi_reduction <add>, %53, %cst_31 [0] : vector<2x16x128xf32> to vector<16x128xf32>
    %cst_32 = arith.constant dense<0.000000e+00> : vector<128xf32>
    %57 = vector.multi_reduction <add>, %56, %cst_32 [0] : vector<16x128xf32> to vector<128xf32>
    %58 = vector.shape_cast %57 : vector<128xf32> to vector<1x128xf32>
    %59 = arith.mulf %53, %53 : vector<2x16x128xf32>
    %cst_33 = arith.constant dense<0.000000e+00> : vector<16x128xf32>
    %60 = vector.multi_reduction <add>, %59, %cst_33 [0] : vector<2x16x128xf32> to vector<16x128xf32>
    %cst_34 = arith.constant dense<0.000000e+00> : vector<128xf32>
    %61 = vector.multi_reduction <add>, %60, %cst_34 [0] : vector<16x128xf32> to vector<128xf32>
    %62 = vector.shape_cast %61 : vector<128xf32> to vector<1x128xf32>
    %cst_35 = arith.constant dense<0.000000e+00> : vector<1x8xf32>
    %63 = tpu.matmul %58, %1, %cst_35 {dimension_numbers = #tpu.dot_dimension_numbers<[1], [0], [0], [1], [0, 0, 1, 1], [], []>} : vector<1x128xf32>, vector<128x8xf32>, vector<1x8xf32> -> vector<1x8xf32>
    %cst_36 = arith.constant dense<0.000000e+00> : vector<1x8xf32>
    %64 = tpu.matmul %62, %1, %cst_36 {dimension_numbers = #tpu.dot_dimension_numbers<[1], [0], [0], [1], [0, 0, 1, 1], [], []>} : vector<1x128xf32>, vector<128x8xf32>, vector<1x8xf32> -> vector<1x8xf32>
    %cst_37 = arith.constant 5.120000e+02 : f32
    %65 = vector.broadcast %cst_37 : f32 to vector<1x8xf32>
    %66 = arith.divf %63, %65 : vector<1x8xf32>
    %cst_38 = arith.constant 5.120000e+02 : f32
    %67 = vector.broadcast %cst_38 : f32 to vector<1x8xf32>
    %68 = arith.divf %64, %67 : vector<1x8xf32>
    %69 = arith.mulf %66, %66 : vector<1x8xf32>
    %70 = arith.subf %68, %69 : vector<1x8xf32>
    %cst_39 = arith.constant 9.99999974E-6 : f32
    %71 = vector.broadcast %cst_39 : f32 to vector<1x8xf32>
    %72 = arith.addf %70, %71 : vector<1x8xf32>
    %73 = math.rsqrt %72 : vector<1x8xf32>
    %74 = arith.mulf %54, %73 : vector<1x8xf32>
    %75 = arith.mulf %66, %74 : vector<1x8xf32>
    %76 = arith.subf %55, %75 : vector<1x8xf32>
    %cst_40 = arith.constant dense<0.000000e+00> : vector<1x128xf32>
    %77 = tpu.matmul %74, %2, %cst_40 {dimension_numbers = #tpu.dot_dimension_numbers<[1], [0], [0], [1], [0, 0, 1, 1], [], []>} : vector<1x8xf32>, vector<8x128xf32>, vector<1x128xf32> -> vector<1x128xf32>
    %cst_41 = arith.constant dense<0.000000e+00> : vector<1x128xf32>
    %78 = tpu.matmul %76, %2, %cst_41 {dimension_numbers = #tpu.dot_dimension_numbers<[1], [0], [0], [1], [0, 0, 1, 1], [], []>} : vector<1x8xf32>, vector<8x128xf32>, vector<1x128xf32> -> vector<1x128xf32>
    %79 = vector.shape_cast %77 : vector<1x128xf32> to vector<1x1x128xf32>
    %80 = vector.broadcast %79 : vector<1x1x128xf32> to vector<2x16x128xf32>
    %81 = arith.mulf %53, %80 : vector<2x16x128xf32>
    %82 = vector.shape_cast %78 : vector<1x128xf32> to vector<1x1x128xf32>
    %83 = vector.broadcast %82 : vector<1x1x128xf32> to vector<2x16x128xf32>
    %84 = arith.addf %81, %83 : vector<2x16x128xf32>
    %85 = arith.addf %0, %84 : vector<2x16x128xf32>
    %c0_42 = arith.constant 0 : index
    %c0_43 = arith.constant 0 : index
    %c0_44 = arith.constant 0 : index
    %86 = vector.load %arg9[%c0_42, %c0_43, %c0_44] : memref<2x16x128xf32, #tpu.memory_space<vmem>>, vector<2x16x128xf32>
    tpu.vector_store %arg9[%c0_42, %c0_43, %c0_44], %85 {strides = array<i32>} : memref<2x16x128xf32, #tpu.memory_space<vmem>>, vector<2x16x128xf32>,
    return
  }
}

</mosaic_0001>

<bundles_post_ra>
// kernel: tpu_custom_call.1
= control target key start
LH: loop header
LB: loop body
LE: loop exit
PB: predicated region body
PF: predicated region fallthrough
CT: control target
= control target key end

     0   :  { %14 = vsyncpa [#allocation3], 0  ;;  %s2209_s0 = inlined_call_operand.vmem [shape: f32[2,16,128], index: 0, kind: input, shape index: {}]   ;;  %s2210_s1 = inlined_call_operand.hbm [shape: f32[384,128], index: 1, kind: input, shape index: {}]   ;;  %s2211_s2 = inlined_call_operand.vmem [shape: f32[1,8], index: 2, kind: input, shape index: {}]   ;;  %s2212_s3 = inlined_call_operand.vmem [shape: f32[1,8], index: 3, kind: input, shape index: {}]   ;;  %s2213_s4 = inlined_call_operand.hbm [shape: f32[384,128], index: 4, kind: input, shape index: {}]   ;;  %s2214_s5 = inlined_call_operand.vmem [shape: f32[1,8], index: 5, kind: input, shape index: {}]   ;;  %s2215_s6 = inlined_call_operand.vmem [shape: f32[1,8], index: 6, kind: input, shape index: {}]   ;;  %s2216_s7 = inlined_call_operand.vmem [shape: f32[128,8], index: 7, kind: input, shape index: {}]   ;;  %s2217_s8 = inlined_call_operand.vmem [shape: f32[8,128], index: 8, kind: input, shape index: {}]   ;;  %s2218_s9 = inlined_call_operand.hbm [shape: f32[2,16,128], index: 9, kind: output, shape index: {}]  }
   0x1   :  { %15 = vsyncpa [#allocation6], 0 }
   0x2   :  { %16 = vsyncpa [#allocation4], 0  ;;  %s1811_s30 = smov [#allocation2]  }
   0x3   :  { %s24_s10 = sshll.u32 %s1811_s30, 4  ;;  %s25_s10 = int_to_ptr.vmem [resolvable:$true] %s24_s10 }
   0x4   :  { %s1753_s11 = scalar_lea.vmem %s25_s10, 6144  ;;  %p1758_p1 = scmp.lt.s32.totalorder %s25_s10, %s25_s10 }
   0x5   :  { %p1754_p0 = scmp.ne.s32.totalorder %s25_s10, %s1753_s11  ;;  %p1759_p2 = scmp.lt.s32.totalorder %s1753_s11, %s1753_s11 }
   0x7   :  { %p1760_p3 = por %p1759_p2, %p1758_p1 }
   0x9   :  { %p1761_p4 = pnand %p1760_p3, %p1754_p0 }
   0xb   :  { %1764 = shalt.err (!%p1761_p4)
}
   0xc   :  { %s1812_s12 = smov 128   ;;  %s1813_s13 = smov 8  }
   0xd   :  { %30 = dma.hbm_to_vmem [thread:$0]  %s2210_s1, 6144, %s25_s10, [#allocation3], %s1812_s12, %s1812_s12, %s1813_s13  }
   0xe   :  { %s1814_s16 = smov [#allocation5]  }
   0xf   :  { %s40_s17 = sshll.u32 %s1814_s16, 4  ;;  %s41_s17 = int_to_ptr.vmem [resolvable:$true] %s40_s17 }
  0x10   :  { %s1773_s18 = scalar_lea.vmem %s41_s17, 6144  ;;  %p1778_p6 = scmp.lt.s32.totalorder %s41_s17, %s41_s17 }
  0x11   :  { %p1774_p5 = scmp.ne.s32.totalorder %s41_s17, %s1773_s18  ;;  %p1779_p7 = scmp.lt.s32.totalorder %s1773_s18, %s1773_s18 }
  0x13   :  { %p1780_p8 = por %p1779_p7, %p1778_p6 }
  0x15   :  { %p1781_p9 = pnand %p1780_p8, %p1774_p5 }
  0x17   :  { %1784 = shalt.err (!%p1781_p9)
}
  0x18   :  { %46 = dma.hbm_to_vmem [thread:$0]  %s2213_s4, 6144, %s41_s17, [#allocation6], %s1812_s12, %s1812_s12, %s1813_s13  }
  0x19   :  { %1805 = dma.done.wait [#allocation3], 6144  }
  0x1a   :  { %1806 = vsyncadd [#allocation3], 4294961152 }
  0x1b   :  { %1807 = dma.done.wait [#allocation6], 6144  }
  0x1c   :  { %1808 = vsyncadd [#allocation6], 4294961152  ;;  %v113_v0 = vld [vmem:[#allocation2 + $0xf8] sm:$0xff]  ;;  %v112_v2 = vld [vmem:[#allocation2 + $0xf0] sm:$0xff]  ;;  %vm138_vm0 = vcmask 1040384   ;;  %vm151_vm1 = vcmask 1046528  }
  0x1d   :  { %v97_v1 = vld [vmem:[#allocation2 + $0x78] sm:$0xff]  ;;  %1290 = vmatprep.subr.mxu0 %v113_v0  ;;  %v96_v4 = vld [vmem:[#allocation2 + $0x70] sm:$0xff]  ;;  %v111_v5 = vld [vmem:[#allocation2 + $0xe8] sm:$0xff]  ;;  %vm1816_vm2 = vmmov 0   ;;  %vm508_vm3 = vcmask 64512  }
  0x1e   :  { %v129_v3 = vld [vmem:[#allocation2 + $0x178] sm:$0xff]  ;;  %1291 = vmatpush3.msra.mxu0 %v97_v1  ;;  %v128_v6 = vld [vmem:[#allocation2 + $0x170] sm:$0xff]  ;;  %v95_v7 = vld [vmem:[#allocation2 + $0x68] sm:$0xff] }
  0x1f   :  { %1494 = vmatprep.subr.mxu1 %v129_v3  ;;  %1292 = vmatprep.subr.mxu0 %v112_v2  ;;  %v127_v8 = vld [vmem:[#allocation2 + $0x168] sm:$0xff]  ;;  %v110_v9 = vld [vmem:[#allocation2 + $0xe0] sm:$0xff]  ;;  %v109_v12 = vld [vmem:[#allocation2 + $0xd8] sm:$0xff] }
  0x20   :  { %1495 = vmatpush3.msra.mxu1 %v129_v3  ;;  %1293 = vmatpush3.msra.mxu0 %v96_v4  ;;  %v94_v10 = vld [vmem:[#allocation2 + $0x60] sm:$0xff]  ;;  %v93_v13 = vld [vmem:[#allocation2 + $0x58] sm:$0xff]  ;;  %v108_v15 = vld [vmem:[#allocation2 + $0xd0] sm:$0xff]  ;;  %v1815_v4 = vmov 0.0  }
  0x21   :  { %1496 = vmatprep.subr.mxu1 %v128_v6  ;;  %1294 = vmatprep.subr.mxu0 %v111_v5  ;;  %v126_v11 = vld [vmem:[#allocation2 + $0x160] sm:$0xff]  ;;  %v125_v14 = vld [vmem:[#allocation2 + $0x158] sm:$0xff]  ;;  %v92_v16 = vld [vmem:[#allocation2 + $0x50] sm:$0xff] }
  0x22   :  { %1497 = vmatpush3.msra.mxu1 %v128_v6  ;;  %1295 = vmatpush3.msra.mxu0 %v95_v7  ;;  %v124_v17 = vld [vmem:[#allocation2 + $0x150] sm:$0xff]  ;;  %v107_v18 = vld [vmem:[#allocation2 + $0xc8] sm:$0xff]  ;;  %v106_v21 = vld [vmem:[#allocation2 + $0xc0] sm:$0xff] }
  0x23   :  { %1498 = vmatprep.subr.mxu1 %v127_v8  ;;  %1296 = vmatprep.subr.mxu0 %v110_v9  ;;  %v91_v19 = vld [vmem:[#allocation2 + $0x48] sm:$0xff]  ;;  %v90_v22 = vld [vmem:[#allocation2 + $0x40] sm:$0xff]  ;;  %v105_v24 = vld [vmem:[#allocation2 + $0xb8] sm:$0xff] }
  0x24   :  { %1499 = vmatpush3.msra.mxu1 %v127_v8  ;;  %1297 = vmatpush3.msra.mxu0 %v94_v10  ;;  %v123_v20 = vld [vmem:[#allocation2 + $0x148] sm:$0xff]  ;;  %v122_v23 = vld [vmem:[#allocation2 + $0x140] sm:$0xff]  ;;  %v89_v25 = vld [vmem:[#allocation2 + $0x38] sm:$0xff] }
  0x25   :  { %1500 = vmatprep.subr.mxu1 %v126_v11  ;;  %1298 = vmatprep.subr.mxu0 %v109_v12  ;;  %v121_v26 = vld [vmem:[#allocation2 + $0x138] sm:$0xff]  ;;  %v104_v27 = vld [vmem:[#allocation2 + $0xb0] sm:$0xff]  ;;  %v103_v30 = vld [vmem:[#allocation2 + $0xa8] sm:$0xff] }
  0x26   :  { %1501 = vmatpush3.msra.mxu1 %v126_v11  ;;  %1299 = vmatpush3.msra.mxu0 %v93_v13  ;;  %v88_v28 = vld [vmem:[#allocation2 + $0x30] sm:$0xff]  ;;  %v87_v31 = vld [vmem:[#allocation2 + $0x28] sm:$0xff]  ;;  %v102_v33 = vld [vmem:[#allocation2 + $0xa0] sm:$0xff] }
  0x27   :  { %1502 = vmatprep.subr.mxu1 %v125_v14  ;;  %1300 = vmatprep.subr.mxu0 %v108_v15  ;;  %v120_v29 = vld [vmem:[#allocation2 + $0x130] sm:$0xff]  ;;  %v119_v32 = vld [vmem:[#allocation2 + $0x128] sm:$0xff]  ;;  %v86_v34 = vld [vmem:[#allocation2 + $0x20] sm:$0xff] }
  0x28   :  { %1503 = vmatpush3.msra.mxu1 %v125_v14  ;;  %1301 = vmatpush3.msra.mxu0 %v92_v16  ;;  %v118_v35 = vld [vmem:[#allocation2 + $0x120] sm:$0xff]  ;;  %v101_v36 = vld [vmem:[#allocation2 + $0x98] sm:$0xff]  ;;  %v100_v40 = vld [vmem:[#allocation2 + $0x90] sm:$0xff] }
  0x29   :  { %1504 = vmatprep.subr.mxu1 %v124_v17  ;;  %1302 = vmatprep.subr.mxu0 %v107_v18  ;;  %v85_v37 = vld [vmem:[#allocation2 + $0x18] sm:$0xff]  ;;  %v61_v39 = vld [vmem:[%s2209_s0] sm:$0xff]  ;;  %v62_v41 = vld [vmem:[%s2209_s0 + $0x8] sm:$0xff] }
  0x2a   :  { %1505 = vmatpush3.msra.mxu1 %v124_v17  ;;  %1303 = vmatpush3.msra.mxu0 %v91_v19  ;;  %v117_v38 = vld [vmem:[#allocation2 + $0x118] sm:$0xff]  ;;  %v84_v42 = vld [vmem:[#allocation2 + $0x10] sm:$0xff]  ;;  %v99_v44 = vld [vmem:[#allocation2 + $0x88] sm:$0xff]  ;;  %v132_v45 = vrot.slane %v61_v39, 1  ;;  %v139_v46 = vrot.slane %v61_v39, 7  ;;  %v152_v51 = vrot.slane %v62_v41, 1 }
  0x2b   :  { %1506 = vmatprep.subr.mxu1 %v123_v20  ;;  %1304 = vmatprep.subr.mxu0 %v106_v21  ;;  %v116_v43 = vld [vmem:[#allocation2 + $0x110] sm:$0xff]  ;;  %v64_v48 = vld [vmem:[%s2209_s0 + $0x18] sm:$0xff]  ;;  %v83_v49 = vld [vmem:[#allocation2 + $0x8] sm:$0xff]  ;;  %v140_v53 = vrot.slane %v62_v41, 7 }
  0x2c   :  { %1507 = vmatpush3.msra.mxu1 %v123_v20  ;;  %1305 = vmatpush3.msra.mxu0 %v90_v22  ;;  %v63_v47 = vld [vmem:[%s2209_s0 + $0x10] sm:$0xff]  ;;  %v115_v50 = vld [vmem:[#allocation2 + $0x108] sm:$0xff]  ;;  %v98_v52 = vld [vmem:[#allocation2 + $0x80] sm:$0xff]  ;;  %v154_v56 = vrot.slane %v64_v48, 1  ;;  %v149_v57 = vsel %vm138_vm0, %v132_v45, %v139_v46  ;;  %v153_v59 = vsel %vm151_vm1, %v132_v45, %v152_v51  ;;  %v143_v61 = vrot.slane %v64_v48, 7 }
  0x2d   :  { %1508 = vmatprep.subr.mxu1 %v122_v23  ;;  %1306 = vmatprep.subr.mxu0 %v105_v24  ;;  %v82_v54 = vld [vmem:[#allocation2] sm:$0xff]  ;;  %v133_v55 = vrot.slane %v63_v47, 1  ;;  %v162_v60 = vsel %vm151_vm1, %v152_v51, %v140_v53  ;;  %v141_v63 = vsel %vm138_vm0, %v139_v46, %v140_v53  ;;  %v142_v0 = vrot.slane %v63_v47, 7  ;;  %v1904_v5 = vld [vmem:[%s2216_s7 + $0x78] sm:$0xff]  ;;  %v1913_v6 = vld [vmem:[%s2216_s7 + $0x70] sm:$0xff] }
  0x2e   :  { %1509 = vmatpush3.msra.mxu1 %v122_v23  ;;  %1307 = vmatpush3.msra.mxu0 %v89_v25  ;;  %v114_v58 = vld [vmem:[#allocation2 + $0x100] sm:$0xff]  ;;  %v163_v1 = vsel %vm151_vm1, %v154_v56, %v143_v61  ;;  %v1922_v7 = vld [vmem:[%s2216_s7 + $0x68] sm:$0xff]  ;;  %v1940_v9 = vld [vmem:[%s2216_s7 + $0x58] sm:$0xff] }
  0x2f   :  { %1510 = vmatprep.subr.mxu1 %v121_v26  ;;  %1308 = vmatprep.subr.mxu0 %v104_v27  ;;  %v155_v62 = vsel %vm151_vm1, %v133_v55, %v154_v56  ;;  %v150_v2 = vsel %vm138_vm0, %v133_v55, %v142_v0  ;;  %v144_v3 = vsel %vm138_vm0, %v142_v0, %v143_v61  ;;  %v1931_v8 = vld [vmem:[%s2216_s7 + $0x60] sm:$0xff]  ;;  %v1949_v10 = vld [vmem:[%s2216_s7 + $0x50] sm:$0xff]  ;;  %v1958_v11 = vld [vmem:[%s2216_s7 + $0x48] sm:$0xff] }
  0x30   :  { %1511 = vmatpush3.msra.mxu1 %v121_v26  ;;  %1309 = vmatpush3.msra.mxu0 %v88_v28  ;;  %v1967_v12 = vld [vmem:[%s2216_s7 + $0x40] sm:$0xff]  ;;  %v1976_v13 = vld [vmem:[%s2216_s7 + $0x38] sm:$0xff]  ;;  %v1985_v14 = vld [vmem:[%s2216_s7 + $0x30] sm:$0xff] }
  0x31   :  { %1512 = vmatprep.subr.mxu1 %v120_v29  ;;  %1310 = vmatprep.subr.mxu0 %v103_v30  ;;  %v1994_v15 = vld [vmem:[%s2216_s7 + $0x28] sm:$0xff]  ;;  %v2003_v16 = vld [vmem:[%s2216_s7 + $0x20] sm:$0xff]  ;;  %v2012_v17 = vld [vmem:[%s2216_s7 + $0x18] sm:$0xff] }
  0x32   :  { %1513 = vmatpush3.msra.mxu1 %v120_v29  ;;  %1311 = vmatpush3.msra.mxu0 %v87_v31  ;;  %v2021_v18 = vld [vmem:[%s2216_s7 + $0x10] sm:$0xff]  ;;  %v2027_v19 = vld [vmem:[%s2216_s7 + $0x8] sm:$0xff]  ;;  %v2036_v20 = vld [vmem:[%s2216_s7] sm:$0xff] }
  0x33   :  { %1514 = vmatprep.subr.mxu1 %v119_v32  ;;  %1312 = vmatprep.subr.mxu0 %v102_v33  ;;  %v706_v0 = vld [vmem:[#allocation5 + $0xf8] sm:$0xff] }
  0x34   :  { %1515 = vmatpush3.msra.mxu1 %v119_v32  ;;  %1313 = vmatpush3.msra.mxu0 %v86_v34 }
  0x35   :  { %1516 = vmatprep.subr.mxu1 %v118_v35  ;;  %1314 = vmatprep.subr.mxu0 %v101_v36 }
  0x36   :  { %1517 = vmatpush3.msra.mxu1 %v118_v35  ;;  %1315 = vmatpush3.msra.mxu0 %v85_v37 }
  0x37   :  { %1518 = vmatprep.subr.mxu1 %v117_v38  ;;  %1316 = vmatprep.subr.mxu0 %v100_v40 }
  0x38   :  { %1519 = vmatpush3.msra.mxu1 %v117_v38  ;;  %1317 = vmatpush3.msra.mxu0 %v84_v42 }
  0x39   :  { %1520 = vmatprep.subr.mxu1 %v116_v43  ;;  %1318 = vmatprep.subr.mxu0 %v99_v44 }
  0x3a   :  { %1521 = vmatpush3.msra.mxu1 %v116_v43  ;;  %1319 = vmatpush3.msra.mxu0 %v83_v49 }
  0x3b   :  { %1522 = vmatprep.subr.mxu1 %v115_v50  ;;  %1320 = vmatprep.subr.mxu0 %v98_v52 }
  0x3c   :  { %228 = vmatprep.mubr.f32.mxu0 %v61_v39  ;;  %1321 = vmatpush3.msra.mxu0 %v82_v54 }
  0x3d   :  { %1523 = vmatpush3.msra.mxu1 %v115_v50  ;;  %229 = vmatmul.mubr.f32.vlgmr.msra.gmra.mxu0 %v149_v57 }
  0x3e   :  { %1524 = vmatprep.subr.mxu1 %v114_v58  ;;  %1526 = vmatprep.mubr.f32.mxu1 %v153_v59 }
  0x3f   :  { %1525 = vmatpush3.msra.mxu1 %v114_v58  ;;  %233 = vmatprep.mubr.f32.mxu0 %v62_v41 }
  0x40   :  { %1527 = vmatmul.mubr.f32.vlgmr.msra.gmra.mxu1 %v162_v60  ;;  %1532 = vmatprep.subr.mxu0 %v1815_v4 }
  0x41   :  { %1529 = vmatprep.mubr.f32.mxu1 %v155_v62  ;;  %234 = vmatmul.mubr.f32.gmra.mxu0 %v141_v63  ;;  %v2077_v63 = vld [vmem:[%s2217_s8] sm:$0xff] }
  0x42   :  { %238 = vmatprep.mubr.f32.mxu0 %v63_v47  ;;  %1567 = vmatprep.subr.mxu1 %v1815_v4 }
  0x43   :  { %1533 = vmatpush3.msra.mxu0 %v1904_v5  ;;  %1568 = vmatpush3.msra.mxu1 %v1904_v5 }
  0x44   :  { %1530 = vmatmul.mubr.f32.gmra.mxu1 %v163_v1  ;;  %1534 = vmatprep.subr.mxu0 %v1815_v4  ;;  %v722_v1 = vld [vmem:[#allocation5 + $0x178] sm:$0xff] }
  0x45   :  { %239 = vmatmul.mubr.f32.gmra.mxu0 %v150_v2  ;;  %1569 = vmatprep.subr.mxu1 %v1815_v4 }
  0x46   :  { %243 = vmatprep.mubr.f32.mxu0 %v64_v48  ;;  %1535 = vmatpush3.msra.mxu0 %v1913_v6 }
  0x47   :  { %1570 = vmatpush3.msra.mxu1 %v1913_v6  ;;  %1536 = vmatprep.subr.mxu0 %v1815_v4 }
  0x48   :  { %1571 = vmatprep.subr.mxu1 %v1815_v4  ;;  %1537 = vmatpush3.msra.mxu0 %v1922_v7 }
  0x49   :  { %244 = vmatmul.mubr.f32.gmra.mxu0 %v144_v3  ;;  %1572 = vmatpush3.msra.mxu1 %v1922_v7 }
  0x4a   :  { %1538 = vmatprep.subr.mxu0 %v1815_v4  ;;  %1573 = vmatprep.subr.mxu1 %v1815_v4 }
  0x4b   :  { %1539 = vmatpush3.msra.mxu0 %v1931_v8  ;;  %1574 = vmatpush3.msra.mxu1 %v1931_v8 }
  0x4c   :  { %1540 = vmatprep.subr.mxu0 %v1815_v4  ;;  %1575 = vmatprep.subr.mxu1 %v1815_v4 }
  0x4d   :  { %1541 = vmatpush3.msra.mxu0 %v1940_v9  ;;  %1576 = vmatpush3.msra.mxu1 %v1940_v9 }
  0x4e   :  { %1542 = vmatprep.subr.mxu0 %v1815_v4  ;;  %1577 = vmatprep.subr.mxu1 %v1815_v4 }
  0x4f   :  { %1543 = vmatpush3.msra.mxu0 %v1949_v10  ;;  %1578 = vmatpush3.msra.mxu1 %v1949_v10 }
  0x50   :  { %1544 = vmatprep.subr.mxu0 %v1815_v4  ;;  %1579 = vmatprep.subr.mxu1 %v1815_v4 }
  0x51   :  { %1545 = vmatpush3.msra.mxu0 %v1958_v11  ;;  %1580 = vmatpush3.msra.mxu1 %v1958_v11 }
  0x52   :  { %1546 = vmatprep.subr.mxu0 %v1815_v4  ;;  %1581 = vmatprep.subr.mxu1 %v1815_v4 }
  0x53   :  { %1547 = vmatpush3.msra.mxu0 %v1967_v12  ;;  %1582 = vmatpush3.msra.mxu1 %v1967_v12 }
  0x54   :  { %1548 = vmatprep.subr.mxu0 %v1815_v4  ;;  %1583 = vmatprep.subr.mxu1 %v1815_v4 }
  0x55   :  { %1549 = vmatpush3.msra.mxu0 %v1976_v13  ;;  %1584 = vmatpush3.msra.mxu1 %v1976_v13 }
  0x56   :  { %1550 = vmatprep.subr.mxu0 %v1815_v4  ;;  %1585 = vmatprep.subr.mxu1 %v1815_v4 }
  0x57   :  { %1551 = vmatpush3.msra.mxu0 %v1985_v14  ;;  %1586 = vmatpush3.msra.mxu1 %v1985_v14 }
  0x58   :  { %1552 = vmatprep.subr.mxu0 %v1815_v4  ;;  %1587 = vmatprep.subr.mxu1 %v1815_v4 }
  0x59   :  { %1553 = vmatpush3.msra.mxu0 %v1994_v15  ;;  %1588 = vmatpush3.msra.mxu1 %v1994_v15 }
  0x5a   :  { %1554 = vmatprep.subr.mxu0 %v1815_v4  ;;  %1589 = vmatprep.subr.mxu1 %v1815_v4 }
  0x5b   :  { %1555 = vmatpush3.msra.mxu0 %v2003_v16  ;;  %1590 = vmatpush3.msra.mxu1 %v2003_v16 }
  0x5c   :  { %1556 = vmatprep.subr.mxu0 %v1815_v4  ;;  %1591 = vmatprep.subr.mxu1 %v1815_v4 }
  0x5d   :  { %1557 = vmatpush3.msra.mxu0 %v2012_v17  ;;  %1592 = vmatpush3.msra.mxu1 %v2012_v17 }
  0x5e   :  { %1558 = vmatprep.subr.mxu0 %v1815_v4  ;;  %1593 = vmatprep.subr.mxu1 %v1815_v4 }
  0x5f   :  { %1559 = vmatpush3.msra.mxu0 %v2021_v18  ;;  %1594 = vmatpush3.msra.mxu1 %v2021_v18 }
  0x60   :  { %1560 = vmatprep.subr.mxu0 %v1815_v4  ;;  %1595 = vmatprep.subr.mxu1 %v1815_v4 }
  0x61   :  { %1561 = vmatpush3.msra.mxu0 %v2027_v19  ;;  %1564 = vmatprep.mubr.msk.f32.mxu0 %vm1816_vm2, %v1815_v4 }
  0x62   :  { %1562 = vmatprep.subr.mxu0 %v1815_v4  ;;  %1596 = vmatpush3.msra.mxu1 %v2027_v19 }
  0x63   :  { %1563 = vmatpush3.msra.mxu0 %v2036_v20  ;;  %1597 = vmatprep.subr.mxu1 %v1815_v4 }
  0x64   :  { %1598 = vmatpush3.msra.mxu1 %v2036_v20  ;;  %1599 = vmatprep.mubr.msk.f32.mxu1 %vm1816_vm2, %v1815_v4 }
  0x65   :  { %1602 = vmatprep.subr.mxu0 %v1815_v4  ;;  %1607 = vmatprep.subr.mxu1 %v1815_v4 }
  0xfd   :  { %v1322_v21 = vpop.f32.mrf.mxu0 }
  0xff   :  { %v1323_v22 = vpop.f32.mrf.mxu0 }
 0x100   :  { %v1528_v23 = vpop.f32.mrf.mxu1  ;;  %v1324_v29 = vadd.f32 %v1323_v22, %v1322_v21 }
 0x101   :  { %v1325_v24 = vpop.f32.mrf.mxu0 }
 0x102   :  { %v315_v25 = vpop.f32.mrf.mxu1 }
 0x103   :  { %v1326_v26 = vpop.f32.mrf.mxu0  ;;  %v2052_v36 = vadd.f32 %v1324_v29, %v315_v25 }
 0x104   :  { %v1531_v27 = vpop.f32.mrf.mxu1  ;;  %v1327_v32 = vadd.f32 %v1326_v26, %v1325_v24 }
 0x105   :  { %v1328_v28 = vpop.f32.mrf.mxu0  ;;  %v345_v42 = vmul.f32 %v2052_v36, %v2052_v36 }
 0x106   :  { %v325_v31 = vpop.f32.mrf.mxu1  ;;  %v2054_v38 = vadd.f32 %v1528_v23, %v1327_v32  ;;  %v335_v32 = vld [vmem:[%s2212_s3] sm:$0x1] }
 0x107   :  { %v1329_v30 = vpop.f32.mrf.mxu0 }
 0x108   :  { %v1330_v33 = vadd.f32 %v1329_v30, %v1328_v28  ;;  %v346_v43 = vmul.f32 %v2054_v38, %v2054_v38  ;;  %v334_v28 = vld [vmem:[%s2211_s2] sm:$0x1] }
 0x109   :  { %v1331_v34 = vpop.f32.mrf.mxu0 }
 0x10a   :  { %v2050_v35 = vadd.f32 %v1330_v33, %v325_v31  ;;  %v690_v31 = vld [vmem:[#allocation5 + $0x78] sm:$0xff]  ;;  %v705_v33 = vld [vmem:[#allocation5 + $0xf0] sm:$0xff] }
 0x10b   :  { %v1332_v37 = vpop.f32.mrf.mxu0 }
 0x10c   :  { %v1333_v39 = vadd.f32 %v1332_v37, %v1331_v34  ;;  %v347_v40 = vmul.f32 %v2050_v35, %v2050_v35  ;;  %v336_v44 = vadd.f32 %v2050_v35, %v2052_v36  ;;  %v689_v37 = vld [vmem:[#allocation5 + $0x70] sm:$0xff] }
 0x10e   :  { %v2058_v41 = vadd.f32 %v1531_v27, %v1333_v39  ;;  %v349_v47 = vadd.f32 %v347_v40, %v345_v42  ;;  %v704_v39 = vld [vmem:[#allocation5 + $0xe8] sm:$0xff] }
 0x10f   :  { %v688_v42 = vld [vmem:[#allocation5 + $0x68] sm:$0xff] }
 0x110   :  { %v337_v45 = vadd.f32 %v2058_v41, %v2054_v38  ;;  %v348_v46 = vmul.f32 %v2058_v41, %v2058_v41 }
 0x112   :  { %v338_v48 = vadd.f32 %v337_v45, %v336_v44  ;;  %v350_v49 = vadd.f32 %v348_v46, %v346_v43  ;;  %v721_v43 = vld [vmem:[#allocation5 + $0x170] sm:$0xff]  ;;  %v703_v44 = vld [vmem:[#allocation5 + $0xe0] sm:$0xff]  ;;  %v720_v46 = vld [vmem:[#allocation5 + $0x168] sm:$0xff] }
 0x113   :  { %v687_v45 = vld [vmem:[#allocation5 + $0x60] sm:$0xff] }
 0x114   :  { %v339_v50 = vrot.slane %v338_v48, 4  ;;  %v351_v51 = vadd.f32 %v350_v49, %v349_v47  ;;  %v702_v47 = vld [vmem:[#allocation5 + $0xd8] sm:$0xff]  ;;  %v719_v49 = vld [vmem:[#allocation5 + $0x160] sm:$0xff] }
 0x116   :  { %v340_v52 = vadd.f32 %v339_v50, %v338_v48  ;;  %v352_v53 = vrot.slane %v351_v51, 4  ;;  %v686_v48 = vld [vmem:[#allocation5 + $0x58] sm:$0xff]  ;;  %v701_v50 = vld [vmem:[#allocation5 + $0xd0] sm:$0xff] }
 0x118   :  { %v341_v54 = vrot.slane %v340_v52, 2  ;;  %v353_v55 = vadd.f32 %v352_v53, %v351_v51  ;;  %v685_v51 = vld [vmem:[#allocation5 + $0x50] sm:$0xff]  ;;  %v700_v53 = vld [vmem:[#allocation5 + $0xc8] sm:$0xff] }
 0x11a   :  { %v342_v56 = vadd.f32 %v341_v54, %v340_v52  ;;  %v354_v57 = vrot.slane %v353_v55, 2  ;;  %v718_v52 = vld [vmem:[#allocation5 + $0x158] sm:$0xff]  ;;  %v684_v54 = vld [vmem:[#allocation5 + $0x48] sm:$0xff] }
 0x11c   :  { %v343_v58 = vrot.slane %v342_v56, 1  ;;  %v355_v59 = vadd.f32 %v354_v57, %v353_v55  ;;  %v717_v55 = vld [vmem:[#allocation5 + $0x150] sm:$0xff]  ;;  %v683_v57 = vld [vmem:[#allocation5 + $0x40] sm:$0xff] }
 0x11e   :  { %v344_v60 = vadd.f32 %v343_v58, %v342_v56  ;;  %v356_v61 = vrot.slane %v355_v59, 1  ;;  %v699_v56 = vld [vmem:[#allocation5 + $0xc0] sm:$0xff]  ;;  %v716_v58 = vld [vmem:[#allocation5 + $0x148] sm:$0xff] }
 0x120   :  { %1565 = vmatmul.mubr.f32.vlgmr.msra.gmra.mxu0 %v344_v60  ;;  %v357_v62 = vadd.f32 %v356_v61, %v355_v59  ;;  %v698_v59 = vld [vmem:[#allocation5 + $0xb8] sm:$0xff]  ;;  %v715_v61 = vld [vmem:[#allocation5 + $0x140] sm:$0xff] }
 0x121   :  { %1604 = vmatprep.mubr.msk.f32.mxu0 %vm1816_vm2, %v1815_v4  ;;  %1603 = vmatpush3.msra.mxu0 %v2077_v63  ;;  %v682_v60 = vld [vmem:[#allocation5 + $0x38] sm:$0xff] }
 0x122   :  { %1600 = vmatmul.mubr.f32.vlgmr.msra.gmra.mxu1 %v357_v62  ;;  %1392 = vmatprep.subr.mxu0 %v706_v0  ;;  %v714_v62 = vld [vmem:[#allocation5 + $0x138] sm:$0xff]  ;;  %v697_v0 = vld [vmem:[#allocation5 + $0xb0] sm:$0xff] }
 0x123   :  { %1609 = vmatprep.mubr.msk.f32.mxu1 %vm1816_vm2, %v1815_v4  ;;  %1608 = vmatpush3.msra.mxu1 %v2077_v63 }
 0x124   :  { %1612 = vmatprep.subr.mxu1 %v722_v1 }
 0x1e0   :  { %v424_v2 = vpop.f32.mrf.mxu0 }
 0x1e1   :  { %v499_v3 = vmul.f32 0.001953125, %v424_v2  ;;  %v713_v2 = vld [vmem:[#allocation5 + $0x130] sm:$0xff] }
 0x1e2   :  { %v1566_v21 = vpop.f32.mrf.mxu0  ;;  %v494_v22 = vpop.f32.mrf.mxu1 }
 0x1e3   :  { %v501_v23 = vmul.f32 %v499_v3, %v499_v3  ;;  %v500_v24 = vmul.f32 0.001953125, %v494_v22  ;;  %v680_v21 = vld [vmem:[#allocation5 + $0x28] sm:$0xff] }
 0x1e4   :  { %v1601_v25 = vpop.f32.mrf.mxu1  ;;  %v712_v22 = vld [vmem:[#allocation5 + $0x128] sm:$0xff] }
 0x1e5   :  { %v502_v26 = vsub.f32 %v500_v24, %v501_v23  ;;  %v695_v23 = vld [vmem:[#allocation5 + $0xa0] sm:$0xff] }
 0x1e6   :  { %v679_v24 = vld [vmem:[#allocation5 + $0x20] sm:$0xff] }
 0x1e7   :  { %v503_v27 = vadd.f32 1e-05, %v502_v26  ;;  %v711_v25 = vld [vmem:[#allocation5 + $0x120] sm:$0xff]  ;;  %v694_v26 = vld [vmem:[#allocation5 + $0x98] sm:$0xff] }
 0x1e9   :  { %1737 = vrsqrt.f32 %v503_v27  ;;  %v678_v27 = vld [vmem:[#allocation5 + $0x18] sm:$0xff] }
 0x1f6   :  { %v1738_v29 = vpop.eup %1737 }
 0x1f7   :  { %v505_v30 = vmul.f32 %v1738_v29, %v334_v28  ;;  %v710_v28 = vld [vmem:[#allocation5 + $0x118] sm:$0xff]  ;;  %v693_v29 = vld [vmem:[#allocation5 + $0x90] sm:$0xff] }
 0x1f9   :  { %1605 = vmatmul.mubr.msk.f32.vlgmr.msra.gmra.mxu0 %vm508_vm3, %v505_v30  ;;  %v506_v34 = vmul.f32 %v505_v30, %v499_v3  ;;  %v696_v3 = vld [vmem:[#allocation5 + $0xa8] sm:$0xff]  ;;  %v677_v30 = vld [vmem:[#allocation5 + $0x10] sm:$0xff] }
 0x1fa   :  { %1393 = vmatpush3.msra.mxu0 %v690_v31  ;;  %v709_v31 = vld [vmem:[#allocation5 + $0x110] sm:$0xff] }
 0x1fb   :  { %v507_v40 = vsub.f32 %v335_v32, %v506_v34  ;;  %1394 = vmatprep.subr.mxu0 %v705_v33  ;;  %v692_v32 = vld [vmem:[#allocation5 + $0x88] sm:$0xff] }
 0x1fc   :  { %1395 = vmatpush3.msra.mxu0 %v689_v37  ;;  %v676_v33 = vld [vmem:[#allocation5 + $0x8] sm:$0xff]  ;;  %v691_v37 = vld [vmem:[#allocation5 + $0x80] sm:$0xff] }
 0x1fd   :  { %1610 = vmatmul.mubr.msk.f32.vlgmr.msra.gmra.mxu1 %vm508_vm3, %v507_v40  ;;  %1396 = vmatprep.subr.mxu0 %v704_v39  ;;  %v708_v34 = vld [vmem:[#allocation5 + $0x108] sm:$0xff]  ;;  %v675_v39 = vld [vmem:[#allocation5] sm:$0xff] }
 0x1fe   :  { %1613 = vmatpush3.msra.mxu1 %v722_v1  ;;  %1397 = vmatpush3.msra.mxu0 %v688_v42  ;;  %v681_v1 = vld [vmem:[#allocation5 + $0x30] sm:$0xff]  ;;  %v707_v40 = vld [vmem:[#allocation5 + $0x100] sm:$0xff]  ;;  %v655_v42 = vlaneseq }
 0x1ff   :  { %1614 = vmatprep.subr.mxu1 %v721_v43  ;;  %1398 = vmatprep.subr.mxu0 %v703_v44 }
 0x200   :  { %1615 = vmatpush3.msra.mxu1 %v721_v43  ;;  %1399 = vmatpush3.msra.mxu0 %v687_v45  ;;  %v656_v43 = vshrl.u32 %v655_v42, 7 }
 0x201   :  { %1616 = vmatprep.subr.mxu1 %v720_v46  ;;  %1400 = vmatprep.subr.mxu0 %v702_v47 }
 0x202   :  { %1617 = vmatpush3.msra.mxu1 %v720_v46  ;;  %1401 = vmatpush3.msra.mxu0 %v686_v48  ;;  %v2091_v44 = vsub.s32 0, %v656_v43 }
 0x203   :  { %1618 = vmatprep.subr.mxu1 %v719_v49  ;;  %1402 = vmatprep.subr.mxu0 %v701_v50 }
 0x204   :  { %1619 = vmatpush3.msra.mxu1 %v719_v49  ;;  %1403 = vmatpush3.msra.mxu0 %v685_v51 }
 0x205   :  { %1620 = vmatprep.subr.mxu1 %v718_v52  ;;  %1404 = vmatprep.subr.mxu0 %v700_v53 }
 0x206   :  { %1621 = vmatpush3.msra.mxu1 %v718_v52  ;;  %1405 = vmatpush3.msra.mxu0 %v684_v54 }
 0x207   :  { %1622 = vmatprep.subr.mxu1 %v717_v55  ;;  %1406 = vmatprep.subr.mxu0 %v699_v56 }
 0x208   :  { %1623 = vmatpush3.msra.mxu1 %v717_v55  ;;  %1407 = vmatpush3.msra.mxu0 %v683_v57 }
 0x209   :  { %1624 = vmatprep.subr.mxu1 %v716_v58  ;;  %1408 = vmatprep.subr.mxu0 %v698_v59 }
 0x20a   :  { %1625 = vmatpush3.msra.mxu1 %v716_v58  ;;  %1409 = vmatpush3.msra.mxu0 %v682_v60 }
 0x20b   :  { %1626 = vmatprep.subr.mxu1 %v715_v61  ;;  %1410 = vmatprep.subr.mxu0 %v697_v0 }
 0x20c   :  { %1627 = vmatpush3.msra.mxu1 %v715_v61  ;;  %1411 = vmatpush3.msra.mxu0 %v681_v1 }
 0x20d   :  { %1628 = vmatprep.subr.mxu1 %v714_v62  ;;  %1412 = vmatprep.subr.mxu0 %v696_v3 }
 0x20e   :  { %1629 = vmatpush3.msra.mxu1 %v714_v62  ;;  %1413 = vmatpush3.msra.mxu0 %v680_v21 }
 0x20f   :  { %1630 = vmatprep.subr.mxu1 %v713_v2  ;;  %1414 = vmatprep.subr.mxu0 %v695_v23 }
 0x210   :  { %1631 = vmatpush3.msra.mxu1 %v713_v2  ;;  %1415 = vmatpush3.msra.mxu0 %v679_v24 }
 0x211   :  { %1632 = vmatprep.subr.mxu1 %v712_v22  ;;  %1416 = vmatprep.subr.mxu0 %v694_v26 }
 0x212   :  { %1633 = vmatpush3.msra.mxu1 %v712_v22  ;;  %1417 = vmatpush3.msra.mxu0 %v678_v27 }
 0x213   :  { %1634 = vmatprep.subr.mxu1 %v711_v25  ;;  %1418 = vmatprep.subr.mxu0 %v693_v29 }
 0x214   :  { %1635 = vmatpush3.msra.mxu1 %v711_v25  ;;  %1419 = vmatpush3.msra.mxu0 %v677_v30 }
 0x215   :  { %1636 = vmatprep.subr.mxu1 %v710_v28  ;;  %1420 = vmatprep.subr.mxu0 %v692_v32 }
 0x216   :  { %1637 = vmatpush3.msra.mxu1 %v710_v28  ;;  %1421 = vmatpush3.msra.mxu0 %v676_v33 }
 0x217   :  { %1638 = vmatprep.subr.mxu1 %v709_v31  ;;  %1422 = vmatprep.subr.mxu0 %v691_v37 }
 0x218   :  { %1639 = vmatpush3.msra.mxu1 %v709_v31  ;;  %1423 = vmatpush3.msra.mxu0 %v675_v39 }
 0x219   :  { %1640 = vmatprep.subr.mxu1 %v708_v34  ;;  %1650 = vmatprep.subr.mxu0 %v1815_v4 }
 0x21a   :  { %1641 = vmatpush3.msra.mxu1 %v708_v34 }
 0x21b   :  { %1642 = vmatprep.subr.mxu1 %v707_v40 }
 0x21c   :  { %1643 = vmatpush3.msra.mxu1 %v707_v40 }
 0x21d   :  { %1685 = vmatprep.subr.mxu1 %v1815_v4 }
 0x2b9   :  { %v578_v45 = vpop.f32.mrf.mxu0 }
 0x2ba   :  { %v658_v46 = vrot.slane %v578_v45, %v2091_v44 }
 0x2bb   :  { %v1606_v47 = vpop.f32.mrf.mxu0 }
 0x2bc   :  { %v660_v48 = vmul.f32 %v658_v46, %v2054_v38  ;;  %v661_v50 = vmul.f32 %v658_v46, %v2050_v35  ;;  %v662_v51 = vmul.f32 %v658_v46, %v2058_v41  ;;  %v659_v53 = vmul.f32 %v658_v46, %v2052_v36 }
 0x2bd   :  { %v651_v49 = vpop.f32.mrf.mxu1 }
 0x2be   :  { %v666_v52 = vrot.slane %v651_v49, %v2091_v44 }
 0x2bf   :  { %v1611_v54 = vpop.f32.mrf.mxu1 }
 0x2c0   :  { %v668_v55 = vadd.f32 %v666_v52, %v660_v48  ;;  %v669_v56 = vadd.f32 %v666_v52, %v661_v50  ;;  %v670_v57 = vadd.f32 %v666_v52, %v662_v51  ;;  %v667_v58 = vadd.f32 %v666_v52, %v659_v53 }
 0x2c2   :  { %v672_v59 = vmax.f32 %v668_v55, 0.0  ;;  %v673_v60 = vmax.f32 %v669_v56, 0.0  ;;  %v674_v61 = vmax.f32 %v670_v57, 0.0  ;;  %v671_v62 = vmax.f32 %v667_v58, 0.0 }
 0x2c4   :  { %819 = vmatprep.mubr.f32.mxu0 %v671_v62  ;;  %v725_v38 = vrot.slane %v671_v62, 1  ;;  %v731_v0 = vrot.slane %v671_v62, 7  ;;  %v743_v1 = vrot.slane %v672_v59, 1  ;;  %v732_v35 = vrot.slane %v672_v59, 7 }
 0x2c5   :  { %v726_v2 = vrot.slane %v673_v60, 1  ;;  %v745_v41 = vrot.slane %v674_v61, 1  ;;  %v735_v22 = vrot.slane %v674_v61, 7  ;;  %v734_v25 = vrot.slane %v673_v60, 7 }
 0x2c6   :  { %v741_v3 = vsel %vm138_vm0, %v725_v38, %v731_v0  ;;  %v744_v36 = vsel %vm151_vm1, %v725_v38, %v743_v1  ;;  %v753_v21 = vsel %vm151_vm1, %v743_v1, %v732_v35  ;;  %v733_v24 = vsel %vm138_vm0, %v731_v0, %v732_v35 }
 0x2c7   :  { %820 = vmatmul.mubr.f32.vlgmr.msra.gmra.mxu0 %v741_v3  ;;  %1644 = vmatprep.mubr.f32.mxu1 %v744_v36  ;;  %v746_v23 = vsel %vm151_vm1, %v726_v2, %v745_v41  ;;  %v754_v26 = vsel %vm151_vm1, %v745_v41, %v735_v22  ;;  %v742_v27 = vsel %vm138_vm0, %v726_v2, %v734_v25  ;;  %v925_v3 = vld [vmem:[%s2214_s5] sm:$0x1]  ;;  %s1817_s5 = smov [#allocation7]  }
 0x2c8   :  { %824 = vmatprep.mubr.f32.mxu0 %v672_v59  ;;  %1645 = vmatmul.mubr.f32.vlgmr.msra.gmra.mxu1 %v753_v21 }
 0x2c9   :  { %1647 = vmatprep.mubr.f32.mxu1 %v746_v23  ;;  %1651 = vmatpush3.msra.mxu0 %v1904_v5 }
 0x2ca   :  { %1652 = vmatprep.subr.mxu0 %v1815_v4  ;;  %1686 = vmatpush3.msra.mxu1 %v1904_v5  ;;  %v736_v5 = vsel %vm138_vm0, %v734_v25, %v735_v22 }
 0x2cb   :  { %825 = vmatmul.mubr.f32.gmra.mxu0 %v733_v24  ;;  %1687 = vmatprep.subr.mxu1 %v1815_v4 }
 0x2cc   :  { %829 = vmatprep.mubr.f32.mxu0 %v673_v60  ;;  %1648 = vmatmul.mubr.f32.gmra.mxu1 %v754_v26 }
 0x2cd   :  { %1653 = vmatpush3.msra.mxu0 %v1913_v6  ;;  %1688 = vmatpush3.msra.mxu1 %v1913_v6 }
 0x2ce   :  { %1654 = vmatprep.subr.mxu0 %v1815_v4  ;;  %1689 = vmatprep.subr.mxu1 %v1815_v4 }
 0x2cf   :  { %830 = vmatmul.mubr.f32.gmra.mxu0 %v742_v27  ;;  %1690 = vmatpush3.msra.mxu1 %v1922_v7 }
 0x2d0   :  { %834 = vmatprep.mubr.f32.mxu0 %v674_v61  ;;  %1655 = vmatpush3.msra.mxu0 %v1922_v7 }
 0x2d1   :  { %1656 = vmatprep.subr.mxu0 %v1815_v4  ;;  %1691 = vmatprep.subr.mxu1 %v1815_v4 }
 0x2d2   :  { %1657 = vmatpush3.msra.mxu0 %v1931_v8  ;;  %1692 = vmatpush3.msra.mxu1 %v1931_v8 }
 0x2d3   :  { %835 = vmatmul.mubr.f32.gmra.mxu0 %v736_v5  ;;  %1658 = vmatprep.subr.mxu0 %v1815_v4 }
 0x2d4   :  { %1659 = vmatpush3.msra.mxu0 %v1940_v9  ;;  %1693 = vmatprep.subr.mxu1 %v1815_v4 }
 0x2d5   :  { %1660 = vmatprep.subr.mxu0 %v1815_v4  ;;  %1694 = vmatpush3.msra.mxu1 %v1940_v9 }
 0x2d6   :  { %1661 = vmatpush3.msra.mxu0 %v1949_v10  ;;  %1695 = vmatprep.subr.mxu1 %v1815_v4 }
 0x2d7   :  { %1662 = vmatprep.subr.mxu0 %v1815_v4  ;;  %1696 = vmatpush3.msra.mxu1 %v1949_v10 }
 0x2d8   :  { %1663 = vmatpush3.msra.mxu0 %v1958_v11  ;;  %1697 = vmatprep.subr.mxu1 %v1815_v4 }
 0x2d9   :  { %1664 = vmatprep.subr.mxu0 %v1815_v4  ;;  %1698 = vmatpush3.msra.mxu1 %v1958_v11 }
 0x2da   :  { %1665 = vmatpush3.msra.mxu0 %v1967_v12  ;;  %1699 = vmatprep.subr.mxu1 %v1815_v4 }
 0x2db   :  { %1666 = vmatprep.subr.mxu0 %v1815_v4  ;;  %1700 = vmatpush3.msra.mxu1 %v1967_v12 }
 0x2dc   :  { %1667 = vmatpush3.msra.mxu0 %v1976_v13  ;;  %1701 = vmatprep.subr.mxu1 %v1815_v4 }
 0x2dd   :  { %1668 = vmatprep.subr.mxu0 %v1815_v4  ;;  %1702 = vmatpush3.msra.mxu1 %v1976_v13 }
 0x2de   :  { %1669 = vmatpush3.msra.mxu0 %v1985_v14  ;;  %1703 = vmatprep.subr.mxu1 %v1815_v4 }
 0x2df   :  { %1670 = vmatprep.subr.mxu0 %v1815_v4  ;;  %1704 = vmatpush3.msra.mxu1 %v1985_v14 }
 0x2e0   :  { %1671 = vmatpush3.msra.mxu0 %v1994_v15  ;;  %1705 = vmatprep.subr.mxu1 %v1815_v4 }
 0x2e1   :  { %1672 = vmatprep.subr.mxu0 %v1815_v4  ;;  %1706 = vmatpush3.msra.mxu1 %v1994_v15 }
 0x2e2   :  { %1673 = vmatpush3.msra.mxu0 %v2003_v16  ;;  %1707 = vmatprep.subr.mxu1 %v1815_v4 }
 0x2e3   :  { %1674 = vmatprep.subr.mxu0 %v1815_v4  ;;  %1708 = vmatpush3.msra.mxu1 %v2003_v16 }
 0x2e4   :  { %1675 = vmatpush3.msra.mxu0 %v2012_v17  ;;  %1709 = vmatprep.subr.mxu1 %v1815_v4 }
 0x2e5   :  { %1676 = vmatprep.subr.mxu0 %v1815_v4  ;;  %1710 = vmatpush3.msra.mxu1 %v2012_v17 }
 0x2e6   :  { %1677 = vmatpush3.msra.mxu0 %v2021_v18  ;;  %1711 = vmatprep.subr.mxu1 %v1815_v4 }
 0x2e7   :  { %1678 = vmatprep.subr.mxu0 %v1815_v4  ;;  %1712 = vmatpush3.msra.mxu1 %v2021_v18 }
 0x2e8   :  { %1679 = vmatpush3.msra.mxu0 %v2027_v19  ;;  %1713 = vmatprep.subr.mxu1 %v1815_v4 }
 0x2e9   :  { %1680 = vmatprep.subr.mxu0 %v1815_v4  ;;  %1682 = vmatprep.mubr.msk.f32.mxu0 %vm1816_vm2, %v1815_v4 }
 0x2ea   :  { %1681 = vmatpush3.msra.mxu0 %v2036_v20  ;;  %1714 = vmatpush3.msra.mxu1 %v2027_v19 }
 0x2eb   :  { %1715 = vmatprep.subr.mxu1 %v1815_v4  ;;  %1717 = vmatprep.mubr.msk.f32.mxu1 %vm1816_vm2, %v1815_v4 }
 0x2ec   :  { %1716 = vmatpush3.msra.mxu1 %v2036_v20  ;;  %1720 = vmatprep.subr.mxu0 %v1815_v4 }
 0x2ed   :  { %1725 = vmatprep.subr.mxu1 %v1815_v4 }
 0x387   :  { %v1424_v6 = vpop.f32.mrf.mxu0 }
 0x388   :  { %v1646_v7 = vpop.f32.mrf.mxu1 }
 0x389   :  { %v1425_v8 = vpop.f32.mrf.mxu0 }
 0x38a   :  { %v906_v9 = vpop.f32.mrf.mxu1  ;;  %v1426_v14 = vadd.f32 %v1425_v8, %v1424_v6 }
 0x38b   :  { %v1427_v10 = vpop.f32.mrf.mxu0 }
 0x38c   :  { %v1649_v12 = vpop.f32.mrf.mxu1  ;;  %v907_v20 = vadd.f32 %v1426_v14, %v906_v9  ;;  %v1741_v14 = vld [vmem:[%s2209_s0] sm:$0xff] }
 0x38d   :  { %v1428_v11 = vpop.f32.mrf.mxu0 }
 0x38e   :  { %v1429_v16 = vadd.f32 %v1428_v11, %v1427_v10  ;;  %v916_v18 = vpop.f32.mrf.mxu1  ;;  %v936_v34 = vmul.f32 %v907_v20, %v907_v20 }
 0x38f   :  { %v1430_v13 = vpop.f32.mrf.mxu0 }
 0x390   :  { %v912_v30 = vadd.f32 %v1646_v7, %v1429_v16  ;;  %v1742_v16 = vld [vmem:[%s2209_s0 + $0x8] sm:$0xff] }
 0x391   :  { %v1431_v15 = vpop.f32.mrf.mxu0 }
 0x392   :  { %v1432_v17 = vadd.f32 %v1431_v15, %v1430_v13  ;;  %v937_v37 = vmul.f32 %v912_v30, %v912_v30 }
 0x393   :  { %v1433_v19 = vpop.f32.mrf.mxu0 }
 0x394   :  { %v917_v28 = vadd.f32 %v1432_v17, %v916_v18 }
 0x395   :  { %v1434_v29 = vpop.f32.mrf.mxu0 }
 0x396   :  { %v1435_v31 = vadd.f32 %v1434_v29, %v1433_v19  ;;  %v938_v32 = vmul.f32 %v917_v28, %v917_v28  ;;  %v927_v39 = vadd.f32 %v917_v28, %v907_v20  ;;  %v1744_v19 = vld [vmem:[%s2209_s0 + $0x18] sm:$0xff] }
 0x398   :  { %v922_v33 = vadd.f32 %v1649_v12, %v1435_v31  ;;  %v940_v43 = vadd.f32 %v938_v32, %v936_v34 }
 0x39a   :  { %v928_v40 = vadd.f32 %v922_v33, %v912_v30  ;;  %v939_v42 = vmul.f32 %v922_v33, %v922_v33 }
 0x39c   :  { %v929_v45 = vadd.f32 %v928_v40, %v927_v39  ;;  %v941_v46 = vadd.f32 %v939_v42, %v937_v37 }
 0x39e   :  { %v930_v47 = vrot.slane %v929_v45, 4  ;;  %v942_v48 = vadd.f32 %v941_v46, %v940_v43 }
 0x3a0   :  { %v931_v49 = vadd.f32 %v930_v47, %v929_v45  ;;  %v943_v50 = vrot.slane %v942_v48, 4 }
 0x3a2   :  { %v932_v51 = vrot.slane %v931_v49, 2  ;;  %v944_v52 = vadd.f32 %v943_v50, %v942_v48 }
 0x3a4   :  { %v933_v53 = vadd.f32 %v932_v51, %v931_v49  ;;  %v945_v54 = vrot.slane %v944_v52, 2 }
 0x3a6   :  { %v934_v55 = vrot.slane %v933_v53, 1  ;;  %v946_v56 = vadd.f32 %v945_v54, %v944_v52 }
 0x3a8   :  { %v935_v57 = vadd.f32 %v934_v55, %v933_v53  ;;  %v947_v58 = vrot.slane %v946_v56, 1 }
 0x3aa   :  { %1683 = vmatmul.mubr.f32.vlgmr.msra.gmra.mxu0 %v935_v57  ;;  %v948_v59 = vadd.f32 %v947_v58, %v946_v56 }
 0x3ab   :  { %1721 = vmatpush3.msra.mxu0 %v2077_v63  ;;  %1722 = vmatprep.mubr.msk.f32.mxu0 %vm1816_vm2, %v1815_v4 }
 0x3ac   :  { %1718 = vmatmul.mubr.f32.vlgmr.msra.gmra.mxu1 %v948_v59 }
 0x3ad   :  { %1726 = vmatpush3.msra.mxu1 %v2077_v63  ;;  %1727 = vmatprep.mubr.msk.f32.mxu1 %vm1816_vm2, %v1815_v4  ;;  %v926_v4 = vld [vmem:[%s2215_s6] sm:$0x1]  ;;  %s1273_s6 = sshll.u32 %s1817_s5, 4  ;;  %s1274_s6 = int_to_ptr.vmem [resolvable:$true] %s1273_s6 }
 0x3ae   :  { %s1785_s10 = scalar_lea.vmem %s1274_s6, 512  ;;  %p1790_p11 = scmp.lt.s32.totalorder %s1274_s6, %s1274_s6 }
 0x3af   :  { %p1786_p10 = scmp.ne.s32.totalorder %s1274_s6, %s1785_s10  ;;  %p1791_p12 = scmp.lt.s32.totalorder %s1785_s10, %s1785_s10 }
 0x3b1   :  { %p1792_p13 = por %p1791_p12, %p1790_p11 }
 0x3b3   :  { %p1793_p0 = pnand %p1792_p13, %p1786_p10 }
 0x46a   :  { %v1015_v60 = vpop.f32.mrf.mxu0 }
 0x46b   :  { %v1089_v61 = vmul.f32 0.001953125, %v1015_v60 }
 0x46c   :  { %v1684_v62 = vpop.f32.mrf.mxu0  ;;  %v1085_v38 = vpop.f32.mrf.mxu1 }
 0x46d   :  { %v1091_v0 = vmul.f32 %v1089_v61, %v1089_v61  ;;  %v1090_v1 = vmul.f32 0.001953125, %v1085_v38 }
 0x46e   :  { %v1719_v35 = vpop.f32.mrf.mxu1 }
 0x46f   :  { %v1092_v2 = vsub.f32 %v1090_v1, %v1091_v0 }
 0x471   :  { %v1093_v41 = vadd.f32 1e-05, %v1092_v2 }
 0x473   :  { %1739 = vrsqrt.f32 %v1093_v41 }
 0x480   :  { %v1740_v36 = vpop.eup %1739 }
 0x481   :  { %v1095_v21 = vmul.f32 %v1740_v36, %v925_v3 }
 0x483   :  { %1723 = vmatmul.mubr.msk.f32.vlgmr.msra.gmra.mxu0 %vm508_vm3, %v1095_v21  ;;  %v1096_v63 = vmul.f32 %v1095_v21, %v1089_v61 }
 0x485   :  { %v1097_v22 = vsub.f32 %v926_v4, %v1096_v63 }
 0x487   :  { %1728 = vmatmul.mubr.msk.f32.vlgmr.msra.gmra.mxu1 %vm508_vm3, %v1097_v22 }
 0x543   :  { %v1167_v23 = vpop.f32.mrf.mxu0 }
 0x544   :  { %v1247_v24 = vrot.slane %v1167_v23, %v2091_v44 }
 0x545   :  { %v1724_v25 = vpop.f32.mrf.mxu0 }
 0x546   :  { %v1248_v26 = vmul.f32 %v1247_v24, %v907_v20  ;;  %v1249_v5 = vmul.f32 %v1247_v24, %v912_v30  ;;  %v1250_v6 = vmul.f32 %v1247_v24, %v917_v28  ;;  %v1251_v7 = vmul.f32 %v1247_v24, %v922_v33 }
 0x547   :  { %v1240_v27 = vpop.f32.mrf.mxu1 }
 0x548   :  { %v1255_v8 = vrot.slane %v1240_v27, %v2091_v44  ;;  %v1743_v44 = vld [vmem:[%s2209_s0 + $0x10] sm:$0xff] }
 0x549   :  { %v1729_v9 = vpop.f32.mrf.mxu1 }
 0x54a   :  { %v1256_v10 = vadd.f32 %v1255_v8, %v1248_v26  ;;  %v1257_v11 = vadd.f32 %v1255_v8, %v1249_v5  ;;  %v1258_v12 = vadd.f32 %v1255_v8, %v1250_v6  ;;  %v1259_v13 = vadd.f32 %v1255_v8, %v1251_v7 }
 0x54c   :  { %v1260_v15 = vadd.f32 %v1741_v14, %v1256_v10  ;;  %v1261_v17 = vadd.f32 %v1742_v16, %v1257_v11  ;;  %v1262_v18 = vadd.f32 %v1743_v44, %v1258_v12  ;;  %v1263_v28 = vadd.f32 %v1744_v19, %v1259_v13 }
 0x54e   :  { %1264 = vst [vmem:[#allocation7] sm:$0xff] %v1260_v15  ;;  %1265 = vst [vmem:[#allocation7 + $0x8] sm:$0xff] %v1261_v17 }
 0x54f   :  { %1266 = vst [vmem:[#allocation7 + $0x10] sm:$0xff] %v1262_v18  ;;  %1267 = vst [vmem:[#allocation7 + $0x18] sm:$0xff] %v1263_v28 }
 0x550   :  { %1796 = shalt.err (!%p1793_p0)
}
 0x551   :  { %1279 = dma.vmem_to_hbm [thread:$0]  %s1274_s6, 512, %s2218_s9, [#allocation4], %s1812_s12, %s1812_s12, %s1813_s13  }
 0x552   :  { %1809 = dma.done.wait [#allocation4], 512  }
 0x553   :  { %1810 = vsyncadd [#allocation4], 4294966784 }
 0x554   :  { %1283 = vsyncpa [#allocation3], 1 }
 0x555   :  { %1284 = vsyncpa [#allocation6], 1 }
 0x556   :  { %1285 = vsyncpa [#allocation4], 1 }

</bundles_post_ra>
